<compile_context>
chip_gen: v5e
topology: v5e:2x2
jax: 0.10.0
libtpu: 0.0.40
codegen_flags: <defaults>
</compile_context>

<pallas_src>
import functools

import jax
import jax.numpy as jnp
from jax import lax
from jax.experimental import pallas as pl
from jax.experimental.pallas import tpu as pltpu


def _make_resblock_kernel(b_tile, T, C, Cp, K):
    """Kernel over one native (b_tile, C, T) NCT block (whole time axis resident)."""
    P = K // 2
    M = b_tile * T                 # matmul M dim: batch x time collapsed into one slab

    def kernel(x_ref, mask_ref, s1_ref, b1_ref, w1_ref,
               s2_ref, b2_ref, w2_ref, cb2_ref, out_ref):
        # ---- layout: native NCT block -> lane-dense (M, Cp) slab, all in VMEM ----
        # Channel pad happens on the sublane axis (8-aligned) BEFORE the XLU
        # transpose, so no wrapper HBM pass carries the C -> Cp inflation.
        x_ct = x_ref[...]                                          # (b_tile, C, T) f32
        if Cp > C:
            x_ct = jnp.concatenate(
                [x_ct, jnp.zeros((b_tile, Cp - C, T), jnp.float32)], axis=1)
        x2d = jnp.transpose(x_ct, (0, 2, 1)).reshape(M, Cp)        # (M, Cp) f32
        m2d = mask_ref[...]                                        # (M, 1)  f32

        # ---- hoisted per-tap validity masks (shared by both conv branches) ----
        # Implements 'same' zero padding in time and blocks roll leakage across
        # batch boundaries inside the collapsed (b_tile*T) slab.
        t_in = lax.broadcasted_iota(jnp.int32, (M, 1), 0) % T
        valid = []
        for k in range(K):
            shift = P - k
            if shift > 0:
                valid.append(t_in >= shift)
            elif shift < 0:
                valid.append(t_in < T + shift)
            else:
                valid.append(None)

        def conv_same(h, w_ref):
            """One fused MXU matmul: im2col (M, K*Cp) @ weight (K*Cp, Cp)."""
            taps = []
            for k in range(K):
                shift = P - k                      # tap k reads h[t + k - P]
                if shift == 0:
                    taps.append(h)
                else:
                    rolled = pltpu.roll(h, shift=shift % M, axis=0)   # XLU, cheap
                    taps.append(jnp.where(valid[k], rolled, 0.0))
            im2col = jnp.concatenate(taps, axis=-1).astype(jnp.bfloat16)
            return jnp.dot(im2col, w_ref[...], preferred_element_type=jnp.float32)

        # branch 1: relu(bn1(x) * mask) -> conv1 (no bias)
        # (Conv1d masks its input again; relu(masked) is already zero there.)
        h1 = jnp.maximum((x2d * s1_ref[...] + b1_ref[...]) * m2d, 0.0)
        y1 = conv_same(h1, w1_ref)

        # branch 2: relu(bn2(y) * mask) -> conv2, bias added once after the matmul
        h2 = jnp.maximum((y1 * s2_ref[...] + b2_ref[...]) * m2d, 0.0)
        y2 = conv_same(h2, w2_ref) + cb2_ref[...]

        # residual, then back to native NCT (lane padding sliced off in VMEM)
        out2d = x2d + y2                                           # (M, Cp) f32
        out_ct = jnp.transpose(out2d.reshape(b_tile, T, Cp), (0, 2, 1))[:, :C, :]
        out_ref[...] = out_ct.astype(out_ref.dtype)

    return kernel


def _pick_b_tile(B, T, C, Cp, K):
    """Batch sub-tile per grid step: aim for matmul M = b_tile*T >= 256 under a
    few-MiB per-step working-set budget.  For tiny batches this collapses the
    whole batch into a single grid step.
    # TODO(synk): on v7x prefer b_tile <= B//2 (grid >= 2) when B allows, to
    # shard grid steps across both TensorCores.
    """
    def step_bytes(d):
        m = d * T
        return (2 * d * C * T * 4        # x / out NCT blocks (f32)
                + 3 * m * Cp * 4         # x2d / h / y working slabs (f32)
                + m * K * Cp * 2)        # im2col slab (bf16)
    budget = 8 * 1024 * 1024
    divisors = [d for d in range(1, B + 1) if B % d == 0]
    fitting = [d for d in divisors if step_bytes(d) <= budget] or [1]
    for d in fitting:
        if d * T >= 256:
            return d
    return fitting[-1]


def _vmem_limit_bytes():
    """Generation-aware scoped-VMEM limit: 3/4 of physical VMEM, <= 100 MiB."""
    try:
        phys = int(pltpu.get_tpu_info().vmem_capacity_bytes)
    except Exception:                   # conservative fallback = v7x (64 MiB / TC)
        phys = 64 * 1024 * 1024
    return min((phys * 3) // 4, 100 * 1024 * 1024)


@functools.partial(jax.jit, static_argnames=("kernel_size", "b_tile"))
def resblock_stride1(x_nct, x_mask, x_lengths, params, *, kernel_size, b_tile=None):
    """Forward pass of ResBlock with stride == 1.

    x_nct:      (B, C, T)  float32   (native PyTorch NCT layout; layout + channel
                                      padding handled inside the kernel in VMEM)
    x_mask:     (B, T)     float32 {0, 1}
    x_lengths:  (B,)       int32
    """
    B, C, T = x_nct.shape
    K = kernel_size
    eps = 1e-5
    Cp = ((C + 127) // 128) * 128          # lane-dense channel width (VMEM only)
    if b_tile is None:
        b_tile = _pick_b_tile(B, T, C, Cp, K)
    assert B % b_tile == 0, "b_tile must divide batch"
    assert T % 8 == 0, "T must be a multiple of 8 (sublane-aligned reshapes)"

    # Fold BatchNorm (eval mode) into per-channel scale/shift, pad to Cp.
    # TODO(synk): training-mode batch statistics not implemented.
    def fold_bn(gamma, beta, mean, var):
        scale = gamma / jnp.sqrt(var + eps)
        shift = beta - mean * scale
        return (jnp.pad(scale, (0, Cp - C)).reshape(1, Cp),
                jnp.pad(shift, (0, Cp - C)).reshape(1, Cp))

    s1, b1 = fold_bn(params["bn1_gamma"], params["bn1_beta"],
                     params["bn1_mean"], params["bn1_var"])
    s2, b2 = fold_bn(params["bn2_gamma"], params["bn2_beta"],
                     params["bn2_mean"], params["bn2_var"])

    # Conv weights (C_out, C_in, K) -> fused im2col matrix (K*Cp, Cp), bf16.
    def prep_w(w):
        w = jnp.transpose(w, (2, 1, 0))                       # (K, C_in, C_out)
        w = jnp.pad(w, ((0, 0), (0, Cp - C), (0, Cp - C)))
        return w.reshape(K * Cp, Cp).astype(jnp.bfloat16)

    w1 = prep_w(params["conv1_w"])
    w2 = prep_w(params["conv2_w"])
    cb2 = jnp.pad(params["conv2_b"], (0, Cp - C)).reshape(1, Cp)

    x_in = x_nct.astype(jnp.float32)                          # native NCT, no pad
    mask_flat = x_mask.astype(jnp.float32).reshape(B * T, 1)

    kernel = _make_resblock_kernel(b_tile, T, C, Cp, K)

    out_nct = pl.pallas_call(
        kernel,
        out_shape=jax.ShapeDtypeStruct((B, C, T), jnp.float32),
        grid_spec=pltpu.PrefetchScalarGridSpec(
            num_scalar_prefetch=0,
            grid=(B // b_tile,),
            in_specs=[
                pl.BlockSpec((b_tile, C, T), lambda b: (b, 0, 0)),    # x (NCT)
                pl.BlockSpec((b_tile * T, 1), lambda b: (b, 0)),      # mask
                pl.BlockSpec((1, Cp), lambda b: (0, 0)),              # bn1 scale
                pl.BlockSpec((1, Cp), lambda b: (0, 0)),              # bn1 shift
                pl.BlockSpec((K * Cp, Cp), lambda b: (0, 0)),         # conv1 w
                pl.BlockSpec((1, Cp), lambda b: (0, 0)),              # bn2 scale
                pl.BlockSpec((1, Cp), lambda b: (0, 0)),              # bn2 shift
                pl.BlockSpec((K * Cp, Cp), lambda b: (0, 0)),         # conv2 w
                pl.BlockSpec((1, Cp), lambda b: (0, 0)),              # conv2 bias
            ],
            out_specs=pl.BlockSpec((b_tile, C, T), lambda b: (b, 0, 0)),
        ),
        # x and the output are identical (B, C, T) f32 buffers; each grid step
        # writes exactly the block it read -> safe to alias/donate.
        input_output_aliases={0: 0},
        compiler_params=pltpu.CompilerParams(
            dimension_semantics=("parallel",),     # batch axis across TCs (v7x)
            vmem_limit_bytes=_vmem_limit_bytes()),
    )(x_in, mask_flat, s1, b1, w1, s2, b2, w2, cb2)

    # x.mul(0).mean() is identically zero — no HBM pass needed to produce it.
    zero_loss = jnp.zeros((), dtype=x_nct.dtype)
    return out_nct, x_mask, x_lengths, None, zero_loss


def _reference_forward(x_nct, x_mask, params, kernel_size):
    """Plain-JAX f32 reference (mirrors the PyTorch forward, eval-mode BN)."""
    eps = 1e-5
    K = kernel_size
    P = K // 2
    m = x_mask[:, None, :]

    def bn(x, g, b, mu, var):
        return ((x - mu[None, :, None]) / jnp.sqrt(var[None, :, None] + eps)
                * g[None, :, None] + b[None, :, None])

    dn = ("NCH", "OIH", "NCH")
    h = jax.nn.relu(bn(x_nct, params["bn1_gamma"], params["bn1_beta"],
                       params["bn1_mean"], params["bn1_var"]) * m) * m
    y = lax.conv_general_dilated(h, params["conv1_w"], (1,), [(P, P)],
                                 dimension_numbers=dn)
    h2 = jax.nn.relu(bn(y, params["bn2_gamma"], params["bn2_beta"],
                        params["bn2_mean"], params["bn2_var"]) * m) * m
    y2 = lax.conv_general_dilated(h2, params["conv2_w"], (1,), [(P, P)],
                                  dimension_numbers=dn)
    y2 = y2 + params["conv2_b"][None, :, None]
    return x_nct + y2


if __name__ == "__main__":
    B, C, T, K = 2, 32, 16, 5   # batch, hdim, time, kernel_size (stride = 1)

    key = jax.random.PRNGKey(0)
    keys = jax.random.split(key, 12)

    params = {
        "bn1_gamma": jax.random.normal(keys[0], (C,)) * 0.1 + 1.0,
        "bn1_beta":  jax.random.normal(keys[1], (C,)) * 0.1,
        "bn1_mean":  jax.random.normal(keys[2], (C,)) * 0.1,
        "bn1_var":   jnp.abs(jax.random.normal(keys[3], (C,))) * 0.1 + 1.0,
        "conv1_w":   jax.random.normal(keys[4], (C, C, K)) * 0.05,
        "bn2_gamma": jax.random.normal(keys[5], (C,)) * 0.1 + 1.0,
        "bn2_beta":  jax.random.normal(keys[6], (C,)) * 0.1,
        "bn2_mean":  jax.random.normal(keys[7], (C,)) * 0.1,
        "bn2_var":   jnp.abs(jax.random.normal(keys[8], (C,))) * 0.1 + 1.0,
        "conv2_w":   jax.random.normal(keys[9], (C, C, K)) * 0.05,
        "conv2_b":   jax.random.normal(keys[10], (C,)) * 0.05,
    }
    params = {k: v.astype(jnp.float32) for k, v in params.items()}

    x = jax.random.normal(keys[11], (B, C, T), dtype=jnp.float32)
    x_lengths = jnp.array([T, T - 4], dtype=jnp.int32)
    x_mask = (jnp.arange(T)[None, :] < x_lengths[:, None]).astype(jnp.float32)

    out, out_mask, out_lengths, align, score_loss = resblock_stride1(
        x, x_mask, x_lengths, params, kernel_size=K)
    jax.block_until_ready(out)

    ref = _reference_forward(x, x_mask, params, K)
    # bf16 matmul operands (f32 accumulation) -> slightly looser tolerance.
    assert jnp.allclose(out, ref, atol=3e-2, rtol=3e-2), "mismatch vs reference"
    assert align is None and float(score_loss) == 0.0

    print("KERNEL_OK")
</pallas_src>

<mosaic_0001>
module attributes {stable_mosaic.version = 11 : i64} {
  func.func @kernel(%arg0: i32, %arg1: memref<2x32x16xf32, #tpu.memory_space<vmem>>, %arg2: memref<32x1xf32, #tpu.memory_space<vmem>>, %arg3: memref<1x128xf32, #tpu.memory_space<vmem>>, %arg4: memref<1x128xf32, #tpu.memory_space<vmem>>, %arg5: memref<640x128xbf16, #tpu.memory_space<vmem>>, %arg6: memref<1x128xf32, #tpu.memory_space<vmem>>, %arg7: memref<1x128xf32, #tpu.memory_space<vmem>>, %arg8: memref<640x128xbf16, #tpu.memory_space<vmem>>, %arg9: memref<1x128xf32, #tpu.memory_space<vmem>>, %arg10: memref<2x32x16xf32, #tpu.memory_space<vmem>>) attributes {dimension_semantics = [#tpu.dimension_semantics<parallel>], iteration_bounds = array<i64: 1>, scalar_prefetch = 0 : i64, scratch_operands = 0 : i64, tpu.core_type = #tpu.core_type<tc>, window_params = [{transform_indices = @transform_0, window_bounds = array<i64: 2, 32, 16>}, {transform_indices = @transform_1, window_bounds = array<i64: 32, 1>}, {pipeline_mode = #tpu.pipeline_mode<synchronous>, transform_indices = @transform_2, window_bounds = array<i64: 1, 128>}, {pipeline_mode = #tpu.pipeline_mode<synchronous>, transform_indices = @transform_3, window_bounds = array<i64: 1, 128>}, {pipeline_mode = #tpu.pipeline_mode<synchronous>, transform_indices = @transform_4, window_bounds = array<i64: 640, 128>}, {pipeline_mode = #tpu.pipeline_mode<synchronous>, transform_indices = @transform_5, window_bounds = array<i64: 1, 128>}, {pipeline_mode = #tpu.pipeline_mode<synchronous>, transform_indices = @transform_6, window_bounds = array<i64: 1, 128>}, {pipeline_mode = #tpu.pipeline_mode<synchronous>, transform_indices = @transform_7, window_bounds = array<i64: 640, 128>}, {pipeline_mode = #tpu.pipeline_mode<synchronous>, transform_indices = @transform_8, window_bounds = array<i64: 1, 128>}, {transform_indices = @transform_9, window_bounds = array<i64: 2, 32, 16>}]} {
    %c0 = arith.constant 0 : index
    %c0_0 = arith.constant 0 : index
    %c0_1 = arith.constant 0 : index
    %0 = vector.load %arg1[%c0, %c0_0, %c0_1] : memref<2x32x16xf32, #tpu.memory_space<vmem>>, vector<2x32x16xf32>
    %cst = arith.constant 0.000000e+00 : f32
    %1 = vector.broadcast %cst : f32 to vector<2x96x16xf32>
    %2 = tpu.concatenate %0, %1 in 1 : vector<2x32x16xf32>, vector<2x96x16xf32> -> vector<2x128x16xf32>
    %3 = tpu.transpose %2, [0, 2, 1] : vector<2x128x16xf32> -> vector<2x16x128xf32>
    %4 = vector.shape_cast %3 : vector<2x16x128xf32> to vector<32x128xf32>
    %c0_2 = arith.constant 0 : index
    %c0_3 = arith.constant 0 : index
    %5 = vector.load %arg2[%c0_2, %c0_3] : memref<32x1xf32, #tpu.memory_space<vmem>>, vector<32x1xf32>
    %6 = tpu.iota {dimensions = array<i32: 0>} : vector<32x1xi32>
    %c16_i32 = arith.constant 16 : i32
    %c0_i32 = arith.constant 0 : i32
    %7 = arith.cmpi eq, %c16_i32, %c0_i32 : i32
    %c1_i32 = arith.constant 1 : i32
    %8 = arith.select %7, %c1_i32, %c16_i32 : i32
    %9 = vector.broadcast %8 : i32 to vector<32x1xi32>
    %10 = arith.remsi %6, %9 : vector<32x1xi32>
    %c0_i32_4 = arith.constant 0 : i32
    %11 = vector.broadcast %c0_i32_4 : i32 to vector<32x1xi32>
    %12 = arith.cmpi ne, %10, %11 : vector<32x1xi32>
    %c0_i32_5 = arith.constant 0 : i32
    %13 = vector.broadcast %c0_i32_5 : i32 to vector<32x1xi32>
    %14 = arith.cmpi slt, %10, %13 : vector<32x1xi32>
    %c0_i32_6 = arith.constant 0 : i32
    %15 = arith.cmpi slt, %8, %c0_i32_6 : i32
    %16 = vector.broadcast %15 : i1 to vector<32x1xi1>
    %17 = vector.broadcast %16 : vector<32x1xi1> to vector<32x1xi1>
    %18 = arith.xori %14, %17 : vector<32x1xi1>
    %19 = arith.andi %18, %12 : vector<32x1xi1>
    %20 = vector.broadcast %8 : i32 to vector<32x1xi32>
    %21 = arith.addi %10, %20 : vector<32x1xi32>
    %22 = arith.select %19, %21, %10 : vector<32x1xi1>, vector<32x1xi32>
    %c2_i32 = arith.constant 2 : i32
    %23 = vector.broadcast %c2_i32 : i32 to vector<32x1xi32>
    %24 = arith.cmpi sge, %22, %23 : vector<32x1xi32>
    %c1_i32_7 = arith.constant 1 : i32
    %25 = vector.broadcast %c1_i32_7 : i32 to vector<32x1xi32>
    %26 = arith.cmpi sge, %22, %25 : vector<32x1xi32>
    %c15_i32 = arith.constant 15 : i32
    %27 = vector.broadcast %c15_i32 : i32 to vector<32x1xi32>
    %28 = arith.cmpi slt, %22, %27 : vector<32x1xi32>
    %c14_i32 = arith.constant 14 : i32
    %29 = vector.broadcast %c14_i32 : i32 to vector<32x1xi32>
    %30 = arith.cmpi slt, %22, %29 : vector<32x1xi32>
    %c0_8 = arith.constant 0 : index
    %c0_9 = arith.constant 0 : index
    %31 = vector.load %arg3[%c0_8, %c0_9] : memref<1x128xf32, #tpu.memory_space<vmem>>, vector<1x128xf32>
    %32 = vector.broadcast %31 : vector<1x128xf32> to vector<32x128xf32>
    %33 = arith.mulf %4, %32 : vector<32x128xf32>
    %c0_10 = arith.constant 0 : index
    %c0_11 = arith.constant 0 : index
    %34 = vector.load %arg4[%c0_10, %c0_11] : memref<1x128xf32, #tpu.memory_space<vmem>>, vector<1x128xf32>
    %35 = vector.broadcast %34 : vector<1x128xf32> to vector<32x128xf32>
    %36 = arith.addf %33, %35 : vector<32x128xf32>
    %37 = vector.broadcast %5 : vector<32x1xf32> to vector<32x128xf32>
    %38 = arith.mulf %36, %37 : vector<32x128xf32>
    %cst_12 = arith.constant 0.000000e+00 : f32
    %39 = vector.broadcast %cst_12 : f32 to vector<32x128xf32>
    %40 = arith.maximumf %38, %39 : vector<32x128xf32>
    %c2_i32_13 = arith.constant 2 : i32
    %41 = tpu.dynamic_rotate %40 by %c2_i32_13 dim 0 : vector<32x128xf32>, i32 -> vector<32x128xf32>
    %cst_14 = arith.constant 0.000000e+00 : f32
    %42 = vector.shape_cast %24 : vector<32x1xi1> to vector<32x1xi1>
    %43 = vector.broadcast %42 : vector<32x1xi1> to vector<32x128xi1>
    %44 = vector.broadcast %cst_14 : f32 to vector<32x128xf32>
    %45 = arith.select %43, %41, %44 : vector<32x128xi1>, vector<32x128xf32>
    %c1_i32_15 = arith.constant 1 : i32
    %46 = tpu.dynamic_rotate %40 by %c1_i32_15 dim 0 : vector<32x128xf32>, i32 -> vector<32x128xf32>
    %cst_16 = arith.constant 0.000000e+00 : f32
    %47 = vector.shape_cast %26 : vector<32x1xi1> to vector<32x1xi1>
    %48 = vector.broadcast %47 : vector<32x1xi1> to vector<32x128xi1>
    %49 = vector.broadcast %cst_16 : f32 to vector<32x128xf32>
    %50 = arith.select %48, %46, %49 : vector<32x128xi1>, vector<32x128xf32>
    %c31_i32 = arith.constant 31 : i32
    %51 = tpu.dynamic_rotate %40 by %c31_i32 dim 0 : vector<32x128xf32>, i32 -> vector<32x128xf32>
    %cst_17 = arith.constant 0.000000e+00 : f32
    %52 = vector.shape_cast %28 : vector<32x1xi1> to vector<32x1xi1>
    %53 = vector.broadcast %52 : vector<32x1xi1> to vector<32x128xi1>
    %54 = vector.broadcast %cst_17 : f32 to vector<32x128xf32>
    %55 = arith.select %53, %51, %54 : vector<32x128xi1>, vector<32x128xf32>
    %c30_i32 = arith.constant 30 : i32
    %56 = tpu.dynamic_rotate %40 by %c30_i32 dim 0 : vector<32x128xf32>, i32 -> vector<32x128xf32>
    %cst_18 = arith.constant 0.000000e+00 : f32
    %57 = vector.shape_cast %30 : vector<32x1xi1> to vector<32x1xi1>
    %58 = vector.broadcast %57 : vector<32x1xi1> to vector<32x128xi1>
    %59 = vector.broadcast %cst_18 : f32 to vector<32x128xf32>
    %60 = arith.select %58, %56, %59 : vector<32x128xi1>, vector<32x128xf32>
    %61 = tpu.concatenate %45, %50, %40, %55, %60 in 1 : vector<32x128xf32>, vector<32x128xf32>, vector<32x128xf32>, vector<32x128xf32>, vector<32x128xf32> -> vector<32x640xf32>
    %62 = arith.truncf %61 : vector<32x640xf32> to vector<32x640xbf16>
    %c0_19 = arith.constant 0 : index
    %c0_20 = arith.constant 0 : index
    %63 = vector.load %arg5[%c0_19, %c0_20] : memref<640x128xbf16, #tpu.memory_space<vmem>>, vector<640x128xbf16>
    %cst_21 = arith.constant dense<0.000000e+00> : vector<32x128xf32>
    %64 = tpu.matmul %62, %63, %cst_21 {dimension_numbers = #tpu.dot_dimension_numbers<[1], [0], [0], [1], [0, 0, 1, 1], [], []>} : vector<32x640xbf16>, vector<640x128xbf16>, vector<32x128xf32> -> vector<32x128xf32>
    %c0_22 = arith.constant 0 : index
    %c0_23 = arith.constant 0 : index
    %65 = vector.load %arg6[%c0_22, %c0_23] : memref<1x128xf32, #tpu.memory_space<vmem>>, vector<1x128xf32>
    %66 = vector.broadcast %65 : vector<1x128xf32> to vector<32x128xf32>
    %67 = arith.mulf %64, %66 : vector<32x128xf32>
    %c0_24 = arith.constant 0 : index
    %c0_25 = arith.constant 0 : index
    %68 = vector.load %arg7[%c0_24, %c0_25] : memref<1x128xf32, #tpu.memory_space<vmem>>, vector<1x128xf32>
    %69 = vector.broadcast %68 : vector<1x128xf32> to vector<32x128xf32>
    %70 = arith.addf %67, %69 : vector<32x128xf32>
    %71 = vector.broadcast %5 : vector<32x1xf32> to vector<32x128xf32>
    %72 = arith.mulf %70, %71 : vector<32x128xf32>
    %cst_26 = arith.constant 0.000000e+00 : f32
    %73 = vector.broadcast %cst_26 : f32 to vector<32x128xf32>
    %74 = arith.maximumf %72, %73 : vector<32x128xf32>
    %c2_i32_27 = arith.constant 2 : i32
    %75 = tpu.dynamic_rotate %74 by %c2_i32_27 dim 0 : vector<32x128xf32>, i32 -> vector<32x128xf32>
    %cst_28 = arith.constant 0.000000e+00 : f32
    %76 = vector.shape_cast %24 : vector<32x1xi1> to vector<32x1xi1>
    %77 = vector.broadcast %76 : vector<32x1xi1> to vector<32x128xi1>
    %78 = vector.broadcast %cst_28 : f32 to vector<32x128xf32>
    %79 = arith.select %77, %75, %78 : vector<32x128xi1>, vector<32x128xf32>
    %c1_i32_29 = arith.constant 1 : i32
    %80 = tpu.dynamic_rotate %74 by %c1_i32_29 dim 0 : vector<32x128xf32>, i32 -> vector<32x128xf32>
    %cst_30 = arith.constant 0.000000e+00 : f32
    %81 = vector.shape_cast %26 : vector<32x1xi1> to vector<32x1xi1>
    %82 = vector.broadcast %81 : vector<32x1xi1> to vector<32x128xi1>
    %83 = vector.broadcast %cst_30 : f32 to vector<32x128xf32>
    %84 = arith.select %82, %80, %83 : vector<32x128xi1>, vector<32x128xf32>
    %c31_i32_31 = arith.constant 31 : i32
    %85 = tpu.dynamic_rotate %74 by %c31_i32_31 dim 0 : vector<32x128xf32>, i32 -> vector<32x128xf32>
    %cst_32 = arith.constant 0.000000e+00 : f32
    %86 = vector.shape_cast %28 : vector<32x1xi1> to vector<32x1xi1>
    %87 = vector.broadcast %86 : vector<32x1xi1> to vector<32x128xi1>
    %88 = vector.broadcast %cst_32 : f32 to vector<32x128xf32>
    %89 = arith.select %87, %85, %88 : vector<32x128xi1>, vector<32x128xf32>
    %c30_i32_33 = arith.constant 30 : i32
    %90 = tpu.dynamic_rotate %74 by %c30_i32_33 dim 0 : vector<32x128xf32>, i32 -> vector<32x128xf32>
    %cst_34 = arith.constant 0.000000e+00 : f32
    %91 = vector.shape_cast %30 : vector<32x1xi1> to vector<32x1xi1>
    %92 = vector.broadcast %91 : vector<32x1xi1> to vector<32x128xi1>
    %93 = vector.broadcast %cst_34 : f32 to vector<32x128xf32>
    %94 = arith.select %92, %90, %93 : vector<32x128xi1>, vector<32x128xf32>
    %95 = tpu.concatenate %79, %84, %74, %89, %94 in 1 : vector<32x128xf32>, vector<32x128xf32>, vector<32x128xf32>, vector<32x128xf32>, vector<32x128xf32> -> vector<32x640xf32>
    %96 = arith.truncf %95 : vector<32x640xf32> to vector<32x640xbf16>
    %c0_35 = arith.constant 0 : index
    %c0_36 = arith.constant 0 : index
    %97 = vector.load %arg8[%c0_35, %c0_36] : memref<640x128xbf16, #tpu.memory_space<vmem>>, vector<640x128xbf16>
    %cst_37 = arith.constant dense<0.000000e+00> : vector<32x128xf32>
    %98 = tpu.matmul %96, %97, %cst_37 {dimension_numbers = #tpu.dot_dimension_numbers<[1], [0], [0], [1], [0, 0, 1, 1], [], []>} : vector<32x640xbf16>, vector<640x128xbf16>, vector<32x128xf32> -> vector<32x128xf32>
    %c0_38 = arith.constant 0 : index
    %c0_39 = arith.constant 0 : index
    %99 = vector.load %arg9[%c0_38, %c0_39] : memref<1x128xf32, #tpu.memory_space<vmem>>, vector<1x128xf32>
    %100 = vector.broadcast %99 : vector<1x128xf32> to vector<32x128xf32>
    %101 = arith.addf %98, %100 : vector<32x128xf32>
    %102 = arith.addf %4, %101 : vector<32x128xf32>
    %103 = vector.shape_cast %102 : vector<32x128xf32> to vector<2x16x128xf32>
    %104 = tpu.transpose %103, [0, 2, 1] : vector<2x16x128xf32> -> vector<2x128x16xf32>
    %105 = vector.extract_strided_slice %104 {offsets = [0, 0, 0], sizes = [2, 32, 16], strides = [1, 1, 1]} : vector<2x128x16xf32> to vector<2x32x16xf32>
    %c0_40 = arith.constant 0 : index
    %c0_41 = arith.constant 0 : index
    %c0_42 = arith.constant 0 : index
    %106 = vector.load %arg10[%c0_40, %c0_41, %c0_42] : memref<2x32x16xf32, #tpu.memory_space<vmem>>, vector<2x32x16xf32>
    tpu.vector_store %arg10[%c0_40, %c0_41, %c0_42], %105 {strides = array<i32>} : memref<2x32x16xf32, #tpu.memory_space<vmem>>, vector<2x32x16xf32>,
    return
  }
  func.func @transform_0(%arg0: i32) -> (i32, i32, i32) {
    %c0_i32 = arith.constant 0 : i32
    %c0_i32_0 = arith.constant 0 : i32
    %c0_i32_1 = arith.constant 0 : i32
    return %arg0, %c0_i32, %c0_i32_0 : i32, i32, i32
  }
  func.func @transform_1(%arg0: i32) -> (i32, i32) {
    %c0_i32 = arith.constant 0 : i32
    %c0_i32_0 = arith.constant 0 : i32
    return %arg0, %c0_i32 : i32, i32
  }
  func.func @transform_2(%arg0: i32) -> (i32, i32) {
    %c0_i32 = arith.constant 0 : i32
    %c0_i32_0 = arith.constant 0 : i32
    %c0_i32_1 = arith.constant 0 : i32
    return %c0_i32, %c0_i32_0 : i32, i32
  }
  func.func @transform_3(%arg0: i32) -> (i32, i32) {
    %c0_i32 = arith.constant 0 : i32
    %c0_i32_0 = arith.constant 0 : i32
    %c0_i32_1 = arith.constant 0 : i32
    return %c0_i32, %c0_i32_0 : i32, i32
  }
  func.func @transform_4(%arg0: i32) -> (i32, i32) {
    %c0_i32 = arith.constant 0 : i32
    %c0_i32_0 = arith.constant 0 : i32
    %c0_i32_1 = arith.constant 0 : i32
    return %c0_i32, %c0_i32_0 : i32, i32
  }
  func.func @transform_5(%arg0: i32) -> (i32, i32) {
    %c0_i32 = arith.constant 0 : i32
    %c0_i32_0 = arith.constant 0 : i32
    %c0_i32_1 = arith.constant 0 : i32
    return %c0_i32, %c0_i32_0 : i32, i32
  }
  func.func @transform_6(%arg0: i32) -> (i32, i32) {
    %c0_i32 = arith.constant 0 : i32
    %c0_i32_0 = arith.constant 0 : i32
    %c0_i32_1 = arith.constant 0 : i32
    return %c0_i32, %c0_i32_0 : i32, i32
  }
  func.func @transform_7(%arg0: i32) -> (i32, i32) {
    %c0_i32 = arith.constant 0 : i32
    %c0_i32_0 = arith.constant 0 : i32
    %c0_i32_1 = arith.constant 0 : i32
    return %c0_i32, %c0_i32_0 : i32, i32
  }
  func.func @transform_8(%arg0: i32) -> (i32, i32) {
    %c0_i32 = arith.constant 0 : i32
    %c0_i32_0 = arith.constant 0 : i32
    %c0_i32_1 = arith.constant 0 : i32
    return %c0_i32, %c0_i32_0 : i32, i32
  }
  func.func @transform_9(%arg0: i32) -> (i32, i32, i32) {
    %c0_i32 = arith.constant 0 : i32
    %c0_i32_0 = arith.constant 0 : i32
    %c0_i32_1 = arith.constant 0 : i32
    return %arg0, %c0_i32, %c0_i32_0 : i32, i32, i32
  }
}

</mosaic_0001>

<bundles_post_ra>
// kernel: resblock_stride1.1
= control target key start
LH: loop header
LB: loop body
LE: loop exit
PB: predicated region body
PF: predicated region fallthrough
CT: control target
= control target key end

     0   :  { %v1786_v0 = vmov 0   ;;  %v108_v61 = vlaneseq  ;;  %vm1787_vm5 = vmmov 1   ;;  %s2444_s1 = inlined_call_operand.vmem [shape: f32[32,1], index: 1, kind: input, shape index: {}]   ;;  %s2445_s0 = inlined_call_operand.vmem [shape: f32[2,32,16], index: 0, kind: input, shape index: {}, may-alias: {0,9}]   ;;  %s2446_s2 = inlined_call_operand.vmem [shape: f32[1,128], index: 2, kind: input, shape index: {}]   ;;  %s2447_s3 = inlined_call_operand.vmem [shape: f32[1,128], index: 3, kind: input, shape index: {}]   ;;  %s2448_s4 = inlined_call_operand.vmem [shape: bf16[640,128], index: 4, kind: input, shape index: {}]   ;;  %s2449_s5 = inlined_call_operand.vmem [shape: f32[1,128], index: 5, kind: input, shape index: {}]   ;;  %s2450_s6 = inlined_call_operand.vmem [shape: f32[1,128], index: 6, kind: input, shape index: {}]   ;;  %s2451_s7 = inlined_call_operand.vmem [shape: bf16[640,128], index: 7, kind: input, shape index: {}]   ;;  %s2452_s8 = inlined_call_operand.vmem [shape: f32[1,128], index: 8, kind: input, shape index: {}]   ;;  %s2453_s9 = inlined_call_operand.vmem [shape: f32[2,32,16], index: 9, kind: output, shape index: {}, may-alias: {0,9}]  }
   0x1   :  { %1780 = vset.pattern.permute.xlu1 %v1786_v0  ;;  %v107_v1 = vld [vmem:[%s2444_s1 + $0x18] sm:$0xff]  ;;  %v36_v2 = vld [vmem:[%s2445_s0 + $0x20] sm:$0xff]  ;;  %1779 = vset.pattern.permute.xlu0 %v1786_v0  ;;  %v37_v4 = vld [vmem:[%s2445_s0 + $0x28] sm:$0xff] }
   0x2   :  { %210 = vperm.xlu1 %1780, %v107_v1   ;;  %72 = vxpose.xlu2.b32.start [1/4] (short) (narrow) %v36_v2, 16  ;;  %v104_v3 = vld [vmem:[%s2444_s1] sm:$0xff]  ;;  %v105_v5 = vld [vmem:[%s2444_s1 + $0x8] sm:$0xff]  ;;  %v38_v6 = vld [vmem:[%s2445_s0 + $0x30] sm:$0xff] }
   0x3   :  { %195 = vperm.xlu0 %1779, %v104_v3   ;;  %v106_v7 = vld [vmem:[%s2444_s1 + $0x10] sm:$0xff]  ;;  %v39_v8 = vld [vmem:[%s2445_s0 + $0x38] sm:$0xff]  ;;  %v32_v9 = vld [vmem:[%s2445_s0] sm:$0xff]  ;;  %v2007_v3 = vshrl.u32 %v108_v61, 7 }
   0x4   :  { %v33_v10 = vld [vmem:[%s2445_s0 + $0x8] sm:$0xff]  ;;  %v34_v11 = vld [vmem:[%s2445_s0 + $0x10] sm:$0xff]  ;;  %v35_v12 = vld [vmem:[%s2445_s0 + $0x18] sm:$0xff] }
   0x5   :  { %v1703_v13 = vld [vmem:[%s2448_s4 + $0xb8] sm:$0xff]  ;;  %v1702_v17 = vld [vmem:[%s2448_s4 + $0xb0] sm:$0xff]  ;;  %v1701_v21 = vld [vmem:[%s2448_s4 + $0xa8] sm:$0xff]  ;;  %vm225_vm0 = vcmp.lt.s32.totalorder %v2007_v3, 2  ;;  %vm246_vm1 = vcmp.lt.s32.totalorder %v2007_v3, 1  ;;  %vm267_vm7 = vcmp.lt.s32.totalorder %v2007_v3, 7 }
   0x6   :  { %v1687_v14 = vld [vmem:[%s2448_s4 + $0x38] sm:$0xff]  ;;  %673 = vmatpush.bf16.msra.mxu2 %v1703_v13  ;;  %v1686_v18 = vld [vmem:[%s2448_s4 + $0x30] sm:$0xff]  ;;  %v1685_v22 = vld [vmem:[%s2448_s4 + $0x28] sm:$0xff] }
   0x7   :  { %v1695_v15 = vld [vmem:[%s2448_s4 + $0x78] sm:$0xff]  ;;  %635 = vmatpush.bf16.msra.mxu0 %v1687_v14  ;;  %v1694_v19 = vld [vmem:[%s2448_s4 + $0x70] sm:$0xff]  ;;  %v1693_v23 = vld [vmem:[%s2448_s4 + $0x68] sm:$0xff]  ;;  %v117_v14 = vand.u32 15, %v2007_v3 }
   0x8   :  { %v1711_v16 = vld [vmem:[%s2448_s4 + $0xf8] sm:$0xff]  ;;  %654 = vmatpush.bf16.msra.mxu1 %v1695_v15  ;;  %v1710_v20 = vld [vmem:[%s2448_s4 + $0xf0] sm:$0xff]  ;;  %v1709_v24 = vld [vmem:[%s2448_s4 + $0xe8] sm:$0xff] }
   0x9   :  { %692 = vmatpush.bf16.msra.mxu3 %v1711_v16  ;;  %v1700_v25 = vld [vmem:[%s2448_s4 + $0xa0] sm:$0xff]  ;;  %v1699_v29 = vld [vmem:[%s2448_s4 + $0x98] sm:$0xff]  ;;  %v1698_v33 = vld [vmem:[%s2448_s4 + $0x90] sm:$0xff]  ;;  %vm161_vm2 = vcmp.ge.s32.totalorder %v117_v14, 2  ;;  %vm2042_vm3 = vcmp.ge.s32.totalorder %v117_v14, 1 }
   0xa   :  { %73 = vxpose.xlu2.b32.cont [2/4] (short) (narrow) %v37_v4, 16  ;;  %674 = vmatpush.bf16.msra.mxu2 %v1702_v17  ;;  %v1684_v26 = vld [vmem:[%s2448_s4 + $0x20] sm:$0xff]  ;;  %v1683_v30 = vld [vmem:[%s2448_s4 + $0x18] sm:$0xff]  ;;  %v1682_v34 = vld [vmem:[%s2448_s4 + $0x10] sm:$0xff] }
   0xb   :  { %200 = vperm.xlu0 %1779, %v105_v5   ;;  %636 = vmatpush.bf16.msra.mxu0 %v1686_v18  ;;  %v1692_v27 = vld [vmem:[%s2448_s4 + $0x60] sm:$0xff]  ;;  %v1691_v31 = vld [vmem:[%s2448_s4 + $0x58] sm:$0xff]  ;;  %v1690_v35 = vld [vmem:[%s2448_s4 + $0x50] sm:$0xff] }
   0xc   :  { %655 = vmatpush.bf16.msra.mxu1 %v1694_v19  ;;  %v1708_v28 = vld [vmem:[%s2448_s4 + $0xe0] sm:$0xff]  ;;  %v1707_v32 = vld [vmem:[%s2448_s4 + $0xd8] sm:$0xff]  ;;  %v1706_v36 = vld [vmem:[%s2448_s4 + $0xd0] sm:$0xff] }
   0xd   :  { %693 = vmatpush.bf16.msra.mxu3 %v1710_v20  ;;  %v1697_v37 = vld [vmem:[%s2448_s4 + $0x88] sm:$0xff]  ;;  %v1696_v41 = vld [vmem:[%s2448_s4 + $0x80] sm:$0xff]  ;;  %v1719_v47 = vld [vmem:[%s2448_s4 + $0x138] sm:$0xff] }
   0xe   :  { %675 = vmatpush.bf16.msra.mxu2 %v1701_v21  ;;  %v1681_v38 = vld [vmem:[%s2448_s4 + $0x8] sm:$0xff]  ;;  %v1680_v43 = vld [vmem:[%s2448_s4] sm:$0xff]  ;;  %v1718_v49 = vld [vmem:[%s2448_s4 + $0x130] sm:$0xff] }
   0xf   :  { %637 = vmatpush.bf16.msra.mxu0 %v1685_v22  ;;  %v1689_v39 = vld [vmem:[%s2448_s4 + $0x48] sm:$0xff]  ;;  %v1688_v44 = vld [vmem:[%s2448_s4 + $0x40] sm:$0xff]  ;;  %v1715_v5 = vld [vmem:[%s2448_s4 + $0x118] sm:$0xff] }
  0x10   :  { %656 = vmatpush.bf16.msra.mxu1 %v1693_v23  ;;  %v1705_v40 = vld [vmem:[%s2448_s4 + $0xc8] sm:$0xff]  ;;  %v1704_v45 = vld [vmem:[%s2448_s4 + $0xc0] sm:$0xff]  ;;  %vm2065_vm6 = vmpackc.low %vm1787_vm5, %vm161_vm2 }
  0x11   :  { %694 = vmatpush.bf16.msra.mxu3 %v1709_v24  ;;  %v1781_v51 = vld [vmem:[%s2446_s2] ss:$0 sm:$0xff]  ;;  %v1717_v53 = vld [vmem:[%s2448_s4 + $0x128] sm:$0xff]  ;;  %vm2079_vm8 = vmpackc.low %vm1787_vm5, %vm2042_vm3  ;;  %vm288_vm3 = vcmp.lt.s32.totalorder %v2007_v3, 6 }
  0x12   :  { %74 = vxpose.xlu2.b32.cont [3/4] (short) (narrow) %v38_v6, 16  ;;  %676 = vmatpush.bf16.msra.mxu2 %v1700_v25  ;;  %v1782_v55 = vld [vmem:[%s2447_s3] ss:$0 sm:$0xff]  ;;  %v1713_v17 = vld [vmem:[%s2448_s4 + $0x108] sm:$0xff]  ;;  %v2181_v25 = vld [vmem:[%s2451_s7 + $0xf8] sm:$0xff] }
  0x13   :  { %205 = vperm.xlu0 %1779, %v106_v7   ;;  %638 = vmatpush.bf16.msra.mxu0 %v1684_v26  ;;  %v1716_v58 = vld [vmem:[%s2448_s4 + $0x120] sm:$0xff]  ;;  %v2016_v7 = vadd.s32 8, %v2007_v3  ;;  %v1741_v23 = vld [vmem:[%s2451_s7 + $0xa8] sm:$0xff] }
  0x14   :  { %657 = vmatpush.bf16.msra.mxu1 %v1692_v27 }
  0x15   :  { %695 = vmatpush.bf16.msra.mxu3 %v1708_v28  ;;  %v124_v15 = vand.u32 15, %v2016_v7 }
  0x16   :  { %677 = vmatpush.bf16.msra.mxu2 %v1699_v29 }
  0x17   :  { %639 = vmatpush.bf16.msra.mxu0 %v1683_v30  ;;  %vm2049_vm4 = vcmp.lt.s32.totalorder %v124_v15, 15  ;;  %vm174_vm2 = vcmp.lt.s32.totalorder %v124_v15, 14 }
  0x18   :  { %658 = vmatpush.bf16.msra.mxu1 %v1691_v31  ;;  %v1712_v31 = vld [vmem:[%s2448_s4 + $0x100] sm:$0xff]  ;;  %vm2090_vm9 = vmpackc.low %vm2049_vm4, %vm1787_vm5 }
  0x19   :  { %696 = vmatpush.bf16.msra.mxu3 %v1707_v32  ;;  %vm2151_vm4 = vmpackc.low %vm174_vm2, %vm1787_vm5 }
  0x1a   :  { %75 = vxpose.xlu2.b32.end [4/4] (short) (narrow) %v39_v8, 16  ;;  %678 = vmatpush.bf16.msra.mxu2 %v1698_v33 }
  0x1b   :  { %640 = vmatpush.bf16.msra.mxu0 %v1682_v34 }
  0x1c   :  { %659 = vmatpush.bf16.msra.mxu1 %v1690_v35 }
  0x1d   :  { %697 = vmatpush.bf16.msra.mxu3 %v1706_v36 }
  0x1e   :  { %679 = vmatpush.bf16.msra.mxu2 %v1697_v37 }
  0x1f   :  { %641 = vmatpush.bf16.msra.mxu0 %v1681_v38 }
  0x20   :  { %660 = vmatpush.bf16.msra.mxu1 %v1689_v39 }
  0x21   :  { %698 = vmatpush.bf16.msra.mxu3 %v1705_v40 }
  0x22   :  { %680 = vmatpush.bf16.msra.mxu2 %v1696_v41 }
  0x23   :  { %642 = vmatpush.bf16.msra.mxu0 %v1680_v43 }
  0x24   :  { %661 = vmatpush.bf16.msra.mxu1 %v1688_v44 }
  0x25   :  { %699 = vmatpush.bf16.msra.mxu3 %v1704_v45  ;;  %v111_v45 = vadd.s32 16, %v2007_v3 }
  0x27   :  { %711 = vmatpush.bf16.msrb.mxu0 %v1719_v47  ;;  %v112_v47 = vadd.s32 24, %v2007_v3  ;;  %v1785_v3 = vld [vmem:[%s2452_s8] ss:$0 sm:$0xff] }
  0x2b   :  { %712 = vmatpush.bf16.msrb.mxu0 %v1718_v49  ;;  %v131_v49 = vand.u32 15, %v111_v45  ;;  %v1733_v45 = vld [vmem:[%s2451_s7 + $0x68] sm:$0xff] }
  0x2d   :  { %vm163_vm10 = vcmp.ge.s32.totalorder %v131_v49, 2  ;;  %vm167_vm11 = vcmp.ge.s32.totalorder %v131_v49, 1 }
  0x2e   :  { %vm2112_vm13 = vmpackc.low %vm1787_vm5, %vm163_vm10 }
  0x2f   :  { %713 = vmatpush.bf16.msrb.mxu0 %v1717_v53  ;;  %vm2123_vm14 = vmpackc.low %vm1787_vm5, %vm167_vm11 }
  0x33   :  { %714 = vmatpush.bf16.msrb.mxu0 %v1716_v58 }
  0x37   :  { %40 = vxpose.xlu1.b32.start [1/4] (short) (narrow) %v32_v9, 16  ;;  %715 = vmatpush.bf16.msrb.mxu0 %v1715_v5  ;;  %v1714_v9 = vld [vmem:[%s2448_s4 + $0x110] sm:$0xff] }
  0x3b   :  { %716 = vmatpush.bf16.msrb.mxu0 %v1714_v9 }
  0x3f   :  { %41 = vxpose.xlu1.b32.cont [2/4] (short) (narrow) %v33_v10, 16  ;;  %717 = vmatpush.bf16.msrb.mxu0 %v1713_v17 }
  0x43   :  { %718 = vmatpush.bf16.msrb.mxu0 %v1712_v31  ;;  %v1735_v31 = vld [vmem:[%s2451_s7 + $0x78] sm:$0xff] }
  0x44   :  { %1155 = vmatpush.bf16.msrb.mxu2 %v1735_v31 }
  0x47   :  { %42 = vxpose.xlu1.b32.cont [3/4] (short) (narrow) %v34_v11, 16 }
  0x4f   :  { %43 = vxpose.xlu1.b32.end [4/4] (short) (narrow) %v35_v12, 16 }
  0x74   :  { %v1977_v48 = vpop.permute.xlu1 %210 }
  0x75   :  { %v1961_v42 = vpop.permute.xlu0 %195 }
  0x7d   :  { %v1982_v50 = vpop.permute.xlu0 %200 }
  0x85   :  { %v2003_v63 = vpop.permute.xlu0 %205 }
  0x9b   :  { %v1972_v46 = vpop.trf.xlu2 }
  0x9c   :  { %v183_v54 = vmul.f32 %v1781_v51, %v1972_v46 }
  0x9e   :  { %v191_v60 = vadd.f32 %v1782_v55, %v183_v54 }
  0xa0   :  { %v215_v1 = vmul.f32 %v2003_v63, %v191_v60 }
  0xa2   :  { %v2022_v10 = vmax.f32 %v215_v1, 0.0 }
  0xa3   :  { %v1987_v52 = vpop.trf.xlu2 }
  0xa4   :  { %v184_v56 = vmul.f32 %v1781_v51, %v1987_v52  ;;  %v265_v20 = vrot.slane %v2022_v10, 1  ;;  %v223_v53 = vrot.slane %v2022_v10, 6  ;;  %v244_v54 = vrot.slane %v2022_v10, 7 }
  0xa6   :  { %v192_v62 = vadd.f32 %v1782_v55, %v184_v56 }
  0xa8   :  { %v216_v4 = vmul.f32 %v1977_v48, %v192_v62 }
  0xaa   :  { %v2026_v12 = vmax.f32 %v216_v4, 0.0 }
  0xac   :  { %v224_v22 = vrot.slane %v2026_v12, 6  ;;  %v245_v24 = vrot.slane %v2026_v12, 7  ;;  %v312_v56 = vpack.c.bf16 %v2026_v12, %v2022_v10  ;;  %v287_v7 = vrot.slane %v2026_v12, 2 }
  0xae   :  { %v226_v62 = vsel %vm225_vm0, %v223_v53, %v224_v22 }
  0xdb   :  { %v1997_v57 = vpop.trf.xlu1 }
  0xdc   :  { %v181_v59 = vmul.f32 %v1781_v51, %v1997_v57 }
  0xde   :  { %v189_v0 = vadd.f32 %v1782_v55, %v181_v59 }
  0xe0   :  { %v213_v2 = vmul.f32 %v1961_v42, %v189_v0  ;;  %v247_v0 = vsel %vm246_vm1, %v244_v54, %v245_v24 }
  0xe2   :  { %v2024_v11 = vmax.f32 %v213_v2, 0.0 }
  0xe3   :  { %v2013_v6 = vpop.trf.xlu1 }
  0xe4   :  { %v182_v8 = vmul.f32 %v1781_v51, %v2013_v6  ;;  %v221_v18 = vrot.slane %v2024_v11, 6  ;;  %v242_v19 = vrot.slane %v2024_v11, 7  ;;  %v263_v26 = vrot.slane %v2024_v11, 1 }
  0xe5   :  { %v138_v51 = vand.u32 15, %v112_v47  ;;  %v284_v14 = vrot.slane %v2024_v11, 2  ;;  %v2237_v47 = vld [vmem:[%s2451_s7 + $0xd8] sm:$0xff] }
  0xe6   :  { %v190_v13 = vadd.f32 %v1782_v55, %v182_v8  ;;  %v229_v32 = vsel %vm225_vm0, %v224_v22, %v221_v18  ;;  %v250_v34 = vsel %vm246_vm1, %v245_v24, %v242_v19  ;;  %v266_v55 = vrot.slane %v2026_v12, 1  ;;  %v1743_v12 = vld [vmem:[%s2451_s7 + $0xb8] sm:$0xff]  ;;  %v1742_v22 = vld [vmem:[%s2451_s7 + $0xb0] sm:$0xff] }
  0xe7   :  { %vm172_vm12 = vcmp.lt.s32.totalorder %v138_v51, 15  ;;  %vm176_vm10 = vcmp.lt.s32.totalorder %v138_v51, 14  ;;  %1174 = vmatpush.bf16.msrb.mxu3 %v1743_v12  ;;  %v1736_v51 = vld [vmem:[%s2451_s7 + $0x80] sm:$0xff] }
  0xe8   :  { %v214_v16 = vmul.f32 %v1982_v50, %v190_v13  ;;  %v271_v61 = vsel %vm267_vm7, %v266_v55, %v263_v26  ;;  %v268_v5 = vsel %vm267_vm7, %v265_v20, %v266_v55  ;;  %vm2130_vm15 = vmpackc.low %vm172_vm12, %vm1787_vm5  ;;  %v2252_v55 = vld [vmem:[%s2451_s7 + $0xd0] sm:$0xff] }
  0xe9   :  { %v1488_v9 = vpack.c.bf16 %v271_v61, %v268_v5  ;;  %vm2163_vm11 = vmpackc.low %vm176_vm10, %vm1787_vm5  ;;  %v1758_v5 = vld [vmem:[%s2451_s7 + $0x130] sm:$0xff] }
  0xea   :  { %v2039_v21 = vmax.f32 %v214_v16, 0.0  ;;  %v286_v16 = vrot.slane %v2022_v10, 2  ;;  %v292_v10 = vsel %vm288_vm3, %v287_v7, %v284_v14 }
  0xeb   :  { %1175 = vmatpush.bf16.msrb.mxu3 %v1742_v22  ;;  %v1721_v22 = vld [vmem:[%s2451_s7 + $0x8] sm:$0xff] }
  0xec   :  { %v307_v27 = vpack.c.bf16 %v2039_v21, %v2024_v11  ;;  %v222_v28 = vrot.slane %v2039_v21, 6  ;;  %v243_v29 = vrot.slane %v2039_v21, 7  ;;  %v264_v30 = vrot.slane %v2039_v21, 1 }
  0xed   :  { %v285_v13 = vrot.slane %v2039_v21, 2  ;;  %v289_v11 = vsel %vm288_vm3, %v286_v16, %v287_v7 }
  0xee   :  { %681 = vmatmul.bf16.vlgmr.msra.gmra.mxu2 %v307_v27  ;;  %v228_v35 = vsel %vm225_vm0, %v221_v18, %v222_v28  ;;  %v249_v36 = vsel %vm246_vm1, %v242_v19, %v243_v29  ;;  %v269_v38 = vsel %vm267_vm7, %v264_v30, %v265_v20  ;;  %v270_v39 = vsel %vm267_vm7, %v263_v26, %v264_v30  ;;  %v1740_v26 = vld [vmem:[%s2451_s7 + $0xa0] sm:$0xff]  ;;  %v2190_v27 = vld [vmem:[%s2451_s7 + $0xf0] sm:$0xff]  ;;  %v1727_v30 = vld [vmem:[%s2451_s7 + $0x38] sm:$0xff] }
  0xef   :  { %v1473_v40 = vpack.c.bf16 %v228_v35, %v229_v32  ;;  %v1479_v41 = vpack.c.bf16 %v249_v36, %v250_v34  ;;  %v1485_v44 = vpack.c.bf16 %v269_v38, %v270_v39  ;;  %v227_v58 = vsel %vm225_vm0, %v222_v28, %v223_v53  ;;  %1176 = vmatpush.bf16.msrb.mxu3 %v1741_v23  ;;  %v1739_v28 = vld [vmem:[%s2451_s7 + $0x98] sm:$0xff]  ;;  %v2205_v32 = vld [vmem:[%s2451_s7 + $0xe8] sm:$0xff]  ;;  %v1738_v34 = vld [vmem:[%s2451_s7 + $0x90] sm:$0xff] }
  0xf0   :  { %v248_v59 = vsel %vm246_vm1, %v243_v29, %v244_v54  ;;  %v1476_v2 = vpack.c.bf16 %v226_v62, %v227_v58  ;;  %v290_v17 = vsel %vm288_vm3, %v285_v13, %v286_v16  ;;  %v291_v18 = vsel %vm288_vm3, %v284_v14, %v285_v13  ;;  %1136 = vmatpush.bf16.msrb.mxu1 %v1727_v30  ;;  %v1726_v35 = vld [vmem:[%s2451_s7 + $0x30] sm:$0xff]  ;;  %v2220_v38 = vld [vmem:[%s2451_s7 + $0xe0] sm:$0xff]  ;;  %v1759_v58 = vld [vmem:[%s2451_s7 + $0x138] sm:$0xff] }
  0xf1   :  { %1474 = vmatmul.msk.bf16.vlgmr.msra.gmra.mxu0 %vm2065_vm6, %v1473_v40  ;;  %1480 = vmatmul.msk.bf16.vlgmr.msra.gmra.mxu1 %vm2079_vm8, %v1479_v41  ;;  %v1482_v4 = vpack.c.bf16 %v247_v0, %v248_v59  ;;  %v1491_v20 = vpack.c.bf16 %v290_v17, %v291_v18  ;;  %v1494_v21 = vpack.c.bf16 %v292_v10, %v289_v11  ;;  %v1734_v36 = vld [vmem:[%s2451_s7 + $0x70] sm:$0xff]  ;;  %v1737_v40 = vld [vmem:[%s2451_s7 + $0x88] sm:$0xff]  ;;  %v1724_v53 = vld [vmem:[%s2451_s7 + $0x20] sm:$0xff] }
  0xf2   :  { %1486 = vmatmul.msk.bf16.vlgmr.msra.gmra.mxu3 %vm2090_vm9, %v1485_v44  ;;  %1193 = vmatpush.bf16.msra.mxu0 %v2181_v25  ;;  %v1725_v44 = vld [vmem:[%s2451_s7 + $0x28] sm:$0xff]  ;;  %v1732_v54 = vld [vmem:[%s2451_s7 + $0x60] sm:$0xff]  ;;  %v1723_v0 = vld [vmem:[%s2451_s7 + $0x18] sm:$0xff] }
  0xf3   :  { %1177 = vmatpush.bf16.msrb.mxu3 %v1740_v26  ;;  %1156 = vmatpush.bf16.msrb.mxu2 %v1734_v36  ;;  %v1722_v14 = vld [vmem:[%s2451_s7 + $0x10] sm:$0xff]  ;;  %v2284_v17 = vld [vmem:[%s2451_s7 + $0xc0] sm:$0xff]  ;;  %v1757_v18 = vld [vmem:[%s2451_s7 + $0x128] sm:$0xff] }
  0xf4   :  { %1137 = vmatpush.bf16.msrb.mxu1 %v1726_v35  ;;  %v1730_v16 = vld [vmem:[%s2451_s7 + $0x50] sm:$0xff]  ;;  %v1729_v23 = vld [vmem:[%s2451_s7 + $0x48] sm:$0xff]  ;;  %v1728_v30 = vld [vmem:[%s2451_s7 + $0x40] sm:$0xff] }
  0xf5   :  { %v1755_v35 = vld [vmem:[%s2451_s7 + $0x118] sm:$0xff] }
  0xf6   :  { %1194 = vmatpush.bf16.msra.mxu0 %v2190_v27 }
  0xf7   :  { %1178 = vmatpush.bf16.msrb.mxu3 %v1739_v28  ;;  %1157 = vmatpush.bf16.msrb.mxu2 %v1733_v45  ;;  %v1754_v45 = vld [vmem:[%s2451_s7 + $0x110] sm:$0xff] }
  0xf8   :  { %1138 = vmatpush.bf16.msrb.mxu1 %v1725_v44 }
  0xfa   :  { %1195 = vmatpush.bf16.msra.mxu0 %v2205_v32 }
  0xfb   :  { %1179 = vmatpush.bf16.msrb.mxu3 %v1738_v34  ;;  %1158 = vmatpush.bf16.msrb.mxu2 %v1732_v54  ;;  %v1784_v34 = vld [vmem:[%s2450_s6] ss:$0 sm:$0xff] }
  0xfc   :  { %1139 = vmatpush.bf16.msrb.mxu1 %v1724_v53 }
  0xfe   :  { %686 = vmatmul.bf16.gmra.mxu2 %v312_v56  ;;  %1196 = vmatpush.bf16.msra.mxu0 %v2220_v38 }
  0xff   :  { %1180 = vmatpush.bf16.msrb.mxu3 %v1737_v40 }
 0x100   :  { %1140 = vmatpush.bf16.msrb.mxu1 %v1723_v0 }
 0x101   :  { %1477 = vmatmul.msk.bf16.gmra.mxu0 %vm2112_vm13, %v1476_v2  ;;  %1483 = vmatmul.msk.bf16.gmra.mxu1 %vm2123_vm14, %v1482_v4  ;;  %v1731_v2 = vld [vmem:[%s2451_s7 + $0x58] sm:$0xff]  ;;  %v2269_v4 = vld [vmem:[%s2451_s7 + $0xc8] sm:$0xff] }
 0x102   :  { %1489 = vmatmul.msk.bf16.gmra.mxu3 %vm2130_vm15, %v1488_v9  ;;  %1197 = vmatpush.bf16.msra.mxu0 %v2237_v47 }
 0x103   :  { %1181 = vmatpush.bf16.msrb.mxu3 %v1736_v51  ;;  %1159 = vmatpush.bf16.msrb.mxu2 %v1731_v2 }
 0x104   :  { %1141 = vmatpush.bf16.msrb.mxu1 %v1722_v14 }
 0x106   :  { %1198 = vmatpush.bf16.msra.mxu0 %v2252_v55 }
 0x107   :  { %1768 = vmatpush.bf16.msra.mxu3 %v1759_v58  ;;  %1160 = vmatpush.bf16.msrb.mxu2 %v1730_v16 }
 0x108   :  { %1142 = vmatpush.bf16.msrb.mxu1 %v1721_v22 }
 0x10a   :  { %1199 = vmatpush.bf16.msra.mxu0 %v2269_v4 }
 0x10b   :  { %1769 = vmatpush.bf16.msra.mxu3 %v1758_v5  ;;  %1161 = vmatpush.bf16.msrb.mxu2 %v1729_v23 }
 0x10e   :  { %1200 = vmatpush.bf16.msra.mxu0 %v2284_v17 }
 0x10f   :  { %1770 = vmatpush.bf16.msra.mxu3 %v1757_v18  ;;  %1162 = vmatpush.bf16.msrb.mxu2 %v1728_v30 }
 0x111   :  { %1492 = vmatmul.msk.bf16.vlgmr.msrb.gmra.mxu0 %vm2151_vm4, %v1491_v20 }
 0x113   :  { %1760 = vmatpush.bf16.msra.mxu2 %v2181_v25 }
 0x117   :  { %1761 = vmatpush.bf16.msra.mxu2 %v2190_v27 }
 0x11b   :  { %1762 = vmatpush.bf16.msra.mxu2 %v2205_v32 }
 0x11f   :  { %1763 = vmatpush.bf16.msra.mxu2 %v2220_v38 }
 0x121   :  { %1495 = vmatmul.msk.bf16.gmra.mxu0 %vm2163_vm11, %v1494_v21  ;;  %v2292_v21 = vld [vmem:[%s2449_s5] ss:$0 sm:$0xff] }
 0x123   :  { %1764 = vmatpush.bf16.msra.mxu2 %v2237_v47 }
 0x127   :  { %1765 = vmatpush.bf16.msra.mxu2 %v2252_v55 }
 0x12b   :  { %1766 = vmatpush.bf16.msra.mxu2 %v2269_v4 }
 0x12f   :  { %1767 = vmatpush.bf16.msra.mxu2 %v2284_v17 }
 0x16e   :  { %v644_v24 = vpop.f32.mrf.mxu0  ;;  %v663_v39 = vpop.f32.mrf.mxu1 }
 0x16f   :  { %v664_v59 = vadd.f32 %v663_v39, %v644_v24  ;;  %v1756_v24 = vld [vmem:[%s2451_s7 + $0x120] sm:$0xff] }
 0x170   :  { %1771 = vmatpush.bf16.msra.mxu3 %v1756_v24 }
 0x171   :  { %v682_v49 = vpop.f32.mrf.mxu2 }
 0x172   :  { %v683_v9 = vadd.f32 %v682_v49, %v664_v59 }
 0x174   :  { %1772 = vmatpush.bf16.msra.mxu3 %v1755_v35 }
 0x175   :  { %v701_v56 = vpop.f32.mrf.mxu3 }
 0x176   :  { %v646_v29 = vpop.f32.mrf.mxu0  ;;  %v665_v61 = vpop.f32.mrf.mxu1  ;;  %v702_v20 = vadd.f32 %v701_v56, %v683_v9 }
 0x177   :  { %v666_v7 = vadd.f32 %v665_v61, %v646_v29  ;;  %v1720_v29 = vld [vmem:[%s2451_s7] sm:$0xff] }
 0x178   :  { %1143 = vmatpush.bf16.msrb.mxu1 %v1720_v29  ;;  %1773 = vmatpush.bf16.msra.mxu3 %v1754_v45 }
 0x179   :  { %v684_v13 = vpop.f32.mrf.mxu2 }
 0x17a   :  { %v685_v28 = vadd.f32 %v684_v13, %v666_v7 }
 0x17c   :  { %1212 = vmatpush.bf16.msra.mxu1 %v1759_v58 }
 0x17d   :  { %v703_v10 = vpop.f32.mrf.mxu3 }
 0x17e   :  { %v2225_v41 = vpop.f32.mrf.mxu0  ;;  %v668_v26 = vpop.f32.mrf.mxu1  ;;  %v704_v39 = vadd.f32 %v703_v10, %v685_v28 }
 0x17f   :  { %v669_v40 = vadd.f32 %v668_v26, %v2225_v41  ;;  %v1753_v41 = vld [vmem:[%s2451_s7 + $0x108] sm:$0xff] }
 0x180   :  { %1213 = vmatpush.bf16.msra.mxu1 %v1758_v5  ;;  %1774 = vmatpush.bf16.msra.mxu3 %v1753_v41  ;;  %v1752_v5 = vld [vmem:[%s2451_s7 + $0x100] sm:$0xff] }
 0x181   :  { %v687_v36 = vpop.f32.mrf.mxu2 }
 0x182   :  { %v688_v54 = vadd.f32 %v687_v36, %v669_v40 }
 0x184   :  { %1214 = vmatpush.bf16.msra.mxu1 %v1757_v18  ;;  %1775 = vmatpush.bf16.msra.mxu3 %v1752_v5 }
 0x185   :  { %v706_v53 = vpop.f32.mrf.mxu3 }
 0x186   :  { %v2257_v62 = vpop.f32.mrf.mxu0  ;;  %v670_v59 = vpop.f32.mrf.mxu1  ;;  %v707_v0 = vadd.f32 %v706_v53, %v688_v54 }
 0x187   :  { %v671_v2 = vadd.f32 %v670_v59, %v2257_v62 }
 0x188   :  { %1215 = vmatpush.bf16.msra.mxu1 %v1756_v24 }
 0x189   :  { %v689_v9 = vpop.f32.mrf.mxu2 }
 0x18a   :  { %v690_v27 = vadd.f32 %v689_v9, %v671_v2 }
 0x18c   :  { %1216 = vmatpush.bf16.msra.mxu1 %v1755_v35 }
 0x18e   :  { %v720_v11 = vpop.f32.mrf.mxu0 }
 0x18f   :  { %v721_v12 = vadd.f32 %v720_v11, %v702_v20  ;;  %v708_v20 = vpop.f32.mrf.mxu3 }
 0x190   :  { %v709_v7 = vadd.f32 %v708_v20, %v690_v27  ;;  %1217 = vmatpush.bf16.msra.mxu1 %v1754_v45 }
 0x191   :  { %v734_v31 = vmul.f32 %v2292_v21, %v721_v12 }
 0x193   :  { %v742_v49 = vadd.f32 %v1784_v34, %v734_v31 }
 0x194   :  { %1218 = vmatpush.bf16.msra.mxu1 %v1753_v41 }
 0x195   :  { %v746_v58 = vmul.f32 %v742_v49, %v1961_v42 }
 0x196   :  { %v722_v44 = vpop.f32.mrf.mxu0 }
 0x197   :  { %v723_v51 = vadd.f32 %v722_v44, %v704_v39  ;;  %v2333_v14 = vmax.f32 %v746_v58, 0.0 }
 0x198   :  { %1219 = vmatpush.bf16.msra.mxu1 %v1752_v5 }
 0x199   :  { %v735_v56 = vmul.f32 %v2292_v21, %v723_v51  ;;  %v778_v26 = vrot.slane %v2333_v14, 1  ;;  %v766_v55 = vrot.slane %v2333_v14, 7  ;;  %v790_v51 = vrot.slane %v2333_v14, 2 }
 0x19b   :  { %v743_v61 = vadd.f32 %v1784_v34, %v735_v56 }
 0x19d   :  { %v747_v25 = vmul.f32 %v743_v61, %v1982_v50 }
 0x19e   :  { %v725_v13 = vpop.f32.mrf.mxu0 }
 0x19f   :  { %v2335_v16 = vmax.f32 %v747_v25, 0.0  ;;  %v726_v42 = vadd.f32 %v725_v13, %v707_v0 }
 0x1a1   :  { %v736_v62 = vmul.f32 %v2292_v21, %v726_v42  ;;  %v804_v50 = vpack.c.bf16 %v2335_v16, %v2333_v14  ;;  %v779_v22 = vrot.slane %v2335_v16, 1  ;;  %v767_v31 = vrot.slane %v2335_v16, 7 }
 0x1a2   :  { %v791_v9 = vrot.slane %v2335_v16, 2 }
 0x1a3   :  { %v744_v18 = vadd.f32 %v1784_v34, %v736_v62  ;;  %1182 = vmatmul.bf16.vlgmr.msrb.gmra.mxu3 %v804_v50  ;;  %v772_v40 = vsel %vm246_vm1, %v766_v55, %v767_v31 }
 0x1a5   :  { %v748_v10 = vmul.f32 %v744_v18, %v2003_v63  ;;  %v784_v63 = vsel %vm267_vm7, %v778_v26, %v779_v22 }
 0x1a6   :  { %v727_v11 = vpop.f32.mrf.mxu0 }
 0x1a7   :  { %v752_v12 = vmax.f32 %v748_v10, 0.0  ;;  %v728_v32 = vadd.f32 %v727_v11, %v709_v7 }
 0x1a9   :  { %v737_v23 = vmul.f32 %v2292_v21, %v728_v32  ;;  %v780_v24 = vrot.slane %v752_v12, 1  ;;  %v755_v21 = vrot.slane %v2335_v16, 6  ;;  %v792_v53 = vrot.slane %v752_v12, 2 }
 0x1aa   :  { %v756_v59 = vrot.slane %v752_v12, 6  ;;  %v768_v41 = vrot.slane %v752_v12, 7 }
 0x1ab   :  { %v745_v28 = vadd.f32 %v1784_v34, %v737_v23  ;;  %v783_v38 = vsel %vm267_vm7, %v779_v22, %v780_v24  ;;  %v754_v34 = vrot.slane %v2333_v14, 6  ;;  %v795_v5 = vsel %vm288_vm3, %v791_v9, %v792_v53 }
 0x1ac   :  { %v1669_v29 = vpack.c.bf16 %v783_v38, %v784_v63  ;;  %v759_v17 = vsel %vm225_vm0, %v755_v21, %v756_v59  ;;  %v771_v61 = vsel %vm246_vm1, %v767_v31, %v768_v41  ;;  %v796_v14 = vsel %vm288_vm3, %v790_v51, %v791_v9 }
 0x1ad   :  { %v749_v30 = vmul.f32 %v745_v28, %v1977_v48  ;;  %v760_v48 = vsel %vm225_vm0, %v754_v34, %v755_v21  ;;  %v1675_v42 = vpack.c.bf16 %v795_v5, %v796_v14 }
 0x1ae   :  { %1670 = vmatmul.msk.bf16.vlgmr.msra.gmra.mxu0 %vm2090_vm9, %v1669_v29 }
 0x1af   :  { %v753_v47 = vmax.f32 %v749_v30, 0.0 }
 0x1b1   :  { %v809_v35 = vpack.c.bf16 %v753_v47, %v752_v12  ;;  %v757_v36 = vrot.slane %v753_v47, 6  ;;  %v769_v39 = vrot.slane %v753_v47, 7  ;;  %v793_v49 = vrot.slane %v753_v47, 2 }
 0x1b2   :  { %v781_v25 = vrot.slane %v753_v47, 1 }
 0x1b3   :  { %1187 = vmatmul.bf16.gmra.mxu3 %v809_v35  ;;  %v761_v43 = vsel %vm225_vm0, %v757_v36, %v754_v34  ;;  %v773_v4 = vsel %vm246_vm1, %v769_v39, %v766_v55  ;;  %v794_v54 = vsel %vm288_vm3, %v792_v53, %v793_v49  ;;  %v797_v56 = vsel %vm288_vm3, %v793_v49, %v790_v51 }
 0x1b4   :  { %v1657_v44 = vpack.c.bf16 %v760_v48, %v761_v43  ;;  %v1663_v45 = vpack.c.bf16 %v772_v40, %v773_v4  ;;  %v1678_v58 = vpack.c.bf16 %v797_v56, %v794_v54  ;;  %v758_v33 = vsel %vm225_vm0, %v756_v59, %v757_v36 }
 0x1b5   :  { %v770_v37 = vsel %vm246_vm1, %v768_v41, %v769_v39  ;;  %v1660_v0 = vpack.c.bf16 %v758_v33, %v759_v17  ;;  %v782_v15 = vsel %vm267_vm7, %v780_v24, %v781_v25  ;;  %v785_v13 = vsel %vm267_vm7, %v781_v25, %v778_v26 }
 0x1b6   :  { %1658 = vmatmul.msk.bf16.vlgmr.msrb.gmra.mxu1 %vm2065_vm6, %v1657_v44  ;;  %1664 = vmatmul.msk.bf16.vlgmr.msrb.gmra.mxu2 %vm2079_vm8, %v1663_v45  ;;  %v1666_v2 = vpack.c.bf16 %v770_v37, %v771_v61  ;;  %v1672_v60 = vpack.c.bf16 %v785_v13, %v782_v15  ;;  %vm1299_vm0 = vcmask 130048  }
 0x1c3   :  { %1679 = vmatmul.msk.bf16.vlgmr.msra.gmra.mxu3 %vm2163_vm11, %v1678_v58 }
 0x1c6   :  { %1661 = vmatmul.msk.bf16.gmra.mxu1 %vm2112_vm13, %v1660_v0  ;;  %1667 = vmatmul.msk.bf16.gmra.mxu2 %vm2123_vm14, %v1666_v2 }
 0x1d6   :  { %1673 = vmatmul.msk.bf16.vlgmr.msra.gmra.mxu2 %vm2130_vm15, %v1672_v60  ;;  %1676 = vmatmul.msk.bf16.vlgmr.msra.gmra.mxu1 %vm2151_vm4, %v1675_v42 }
 0x226   :  { %v1183_v1 = vpop.f32.mrf.mxu3 }
 0x22b   :  { %v1202_v32 = vpop.f32.mrf.mxu0 }
 0x22e   :  { %v1185_v62 = vpop.f32.mrf.mxu3 }
 0x233   :  { %v1145_v16 = vpop.f32.mrf.mxu1  ;;  %v1204_v31 = vpop.f32.mrf.mxu0 }
 0x234   :  { %v1146_v10 = vadd.f32 %v1785_v3, %v1145_v16 }
 0x236   :  { %v1188_v7 = vpop.f32.mrf.mxu3 }
 0x239   :  { %v1164_v27 = vpop.f32.mrf.mxu2 }
 0x23a   :  { %v1165_v12 = vadd.f32 %v1164_v27, %v1146_v10 }
 0x23b   :  { %v1147_v50 = vpop.f32.mrf.mxu1 }
 0x23c   :  { %v1184_v22 = vadd.f32 %v1183_v1, %v1165_v12  ;;  %v1148_v23 = vadd.f32 %v1785_v3, %v1147_v50 }
 0x23e   :  { %v1190_v19 = vpop.f32.mrf.mxu3  ;;  %v1203_v38 = vadd.f32 %v1202_v32, %v1184_v22 }
 0x241   :  { %v1166_v20 = vpop.f32.mrf.mxu2 }
 0x242   :  { %v1167_v24 = vadd.f32 %v1166_v20, %v1148_v23 }
 0x243   :  { %v1150_v18 = vpop.f32.mrf.mxu1 }
 0x244   :  { %v1151_v28 = vadd.f32 %v1785_v3, %v1150_v18  ;;  %v1186_v47 = vadd.f32 %v1185_v62, %v1167_v24 }
 0x246   :  { %v1226_v35 = vpop.f32.mrf.mxu3  ;;  %v1205_v48 = vadd.f32 %v1204_v31, %v1186_v47 }
 0x249   :  { %v1169_v11 = vpop.f32.mrf.mxu2 }
 0x24a   :  { %v1170_v29 = vadd.f32 %v1169_v11, %v1151_v28 }
 0x24b   :  { %v1152_v8 = vpop.f32.mrf.mxu1 }
 0x24c   :  { %v1189_v34 = vadd.f32 %v1188_v7, %v1170_v29  ;;  %v1153_v55 = vadd.f32 %v1785_v3, %v1152_v8 }
 0x24e   :  { %v1228_v54 = vpop.f32.mrf.mxu3 }
 0x251   :  { %v1171_v26 = vpop.f32.mrf.mxu2 }
 0x252   :  { %v1172_v40 = vadd.f32 %v1171_v26, %v1153_v55 }
 0x253   :  { %v1221_v63 = vpop.f32.mrf.mxu1 }
 0x254   :  { %v1222_v30 = vadd.f32 %v1221_v63, %v1203_v38  ;;  %v1191_v51 = vadd.f32 %v1190_v19, %v1172_v40 }
 0x256   :  { %v1231_v21 = vadd.f32 %v1222_v30, %v1997_v57 }
 0x258   :  { %1235 = vxpose.xlu0.b32.start [1/2] (short) (narrow) %v1231_v21, 32 }
 0x259   :  { %v1207_v36 = vpop.f32.mrf.mxu2 }
 0x25a   :  { %v1208_v39 = vadd.f32 %v1207_v36, %v1189_v34 }
 0x25b   :  { %v1223_v43 = vpop.f32.mrf.mxu1 }
 0x25c   :  { %v1227_v4 = vadd.f32 %v1226_v35, %v1208_v39  ;;  %v1224_v44 = vadd.f32 %v1223_v43, %v1205_v48 }
 0x25e   :  { %v1232_v45 = vadd.f32 %v1224_v44, %v2013_v6  ;;  %v1233_v49 = vadd.f32 %v1227_v4, %v1972_v46 }
 0x260   :  { %1236 = vxpose.xlu0.b32.end [2/2] (short) (narrow) %v1232_v45, 32  ;;  %1267 = vxpose.xlu2.b32.start [1/2] (short) (narrow) %v1233_v49, 32 }
 0x261   :  { %v1209_v57 = vpop.f32.mrf.mxu2 }
 0x262   :  { %v1210_v53 = vadd.f32 %v1209_v57, %v1191_v51 }
 0x264   :  { %v1229_v56 = vadd.f32 %v1228_v54, %v1210_v53 }
 0x266   :  { %v1234_v59 = vadd.f32 %v1229_v56, %v1987_v52 }
 0x268   :  { %1268 = vxpose.xlu2.b32.end [2/2] (short) (narrow) %v1234_v59, 32 }
 0x2f9   :  { %v1283_v41 = vpop.trf.xlu2 }
 0x2fa   :  { %1304 = vst.msk [vmem:[%s2453_s9 + $0x20] sm:$0xff] %vm1299_vm0, %v1283_v41 }
 0x2fc   :  { %v1251_v6 = vpop.trf.xlu0 }
 0x2fd   :  { %1300 = vst.msk [vmem:[%s2453_s9] sm:$0xff] %vm1299_vm0, %v1251_v6 }
 0x301   :  { %v1284_v46 = vpop.trf.xlu2 }
 0x302   :  { %1305 = vst.msk [vmem:[%s2453_s9 + $0x28] sm:$0xff] %vm1299_vm0, %v1284_v46 }
 0x304   :  { %v1252_v52 = vpop.trf.xlu0 }
 0x305   :  { %1301 = vst.msk [vmem:[%s2453_s9 + $0x8] sm:$0xff] %vm1299_vm0, %v1252_v52 }
 0x309   :  { %v1285_v58 = vpop.trf.xlu2 }
 0x30a   :  { %1306 = vst.msk [vmem:[%s2453_s9 + $0x30] sm:$0xff] %vm1299_vm0, %v1285_v58 }
 0x30c   :  { %v1253_v33 = vpop.trf.xlu0 }
 0x30d   :  { %1302 = vst.msk [vmem:[%s2453_s9 + $0x10] sm:$0xff] %vm1299_vm0, %v1253_v33 }
 0x311   :  { %v1286_v37 = vpop.trf.xlu2 }
 0x312   :  { %1307 = vst.msk [vmem:[%s2453_s9 + $0x38] sm:$0xff] %vm1299_vm0, %v1286_v37 }
 0x314   :  { %v1254_v17 = vpop.trf.xlu0 }
 0x315   :  { %1303 = vst.msk [vmem:[%s2453_s9 + $0x18] sm:$0xff] %vm1299_vm0, %v1254_v17 }

</bundles_post_ra>
